<compile_context>
chip_gen: v7x
topology: tpu7x:2x2x1
jax: 0.10.0
libtpu: 0.0.40
codegen_flags: <defaults>
</compile_context>

<pallas_src>
import functools

import jax
import jax.numpy as jnp
from jax.experimental import pallas as pl
from jax.experimental.pallas import tpu as pltpu

LANE = 128


def _round_up(x, m):
    return ((x + m - 1) // m) * m


def _cdiv(a, b):
    return -(-a // b)


def _make_kernel(num_layers):
    """Kernel over one batch-on-lanes tile.

    Ref order: x^T tile, then (w_i, b_i) pairs, then the output tile.
      x_ref : (dim_input, TN)   mxu_dtype  (batch on lanes)
      w_i   : (out_i, in_i)     mxu_dtype  (PyTorch layout, VMEM-resident)
      b_i   : (out_i, 1)        float32    (VMEM-resident, lane-broadcast)
      o_ref : (dim_output, TN)  float32
    MXU accumulation, bias-add and ReLU are f32; operands feeding the next
    matmul are cast back to mxu_dtype.
    """
    def kernel(*refs):
        x_ref, o_ref = refs[0], refs[-1]
        wb = refs[1:-1]
        mxu_dtype = wb[0].dtype

        h = x_ref[...]
        for layer in range(num_layers):
            w_ref, b_ref = wb[2 * layer], wb[2 * layer + 1]
            h = jnp.dot(w_ref[...], h, preferred_element_type=jnp.float32) + b_ref[...]
            if layer < num_layers - 1:                 # hidden layers: ReLU
                h = jnp.maximum(h, 0.0).astype(mxu_dtype)
        o_ref[...] = h.astype(o_ref.dtype)

        # TODO(synk): dropout (p_dropout > 0) would be fused here with
        # pltpu.prng_seed + pltpu.prng_random_bits; only the default
        # p_dropout = 0 path of FCNet.forward is implemented.
    return kernel


def prepare_params(params, *, num_layers=4, mxu_dtype=jnp.bfloat16):
    """One-time param re-layout (hoisted out of the per-step hot path).

    Weights keep the PyTorch (out, in) layout (the kernel computes W @ h^T),
    cast to `mxu_dtype`; biases become (out, 1) float32 columns that broadcast
    over the batch-on-lanes axis.  With the default mxu_dtype=bf16 the
    inter-layer activations are bf16 end-to-end (f32 accumulate/epilogue);
    pass mxu_dtype=jnp.float32 for strict accuracy.
    """
    flat = []
    for i in range(1, num_layers + 1):
        w = jnp.asarray(params[f'w{i}']).astype(mxu_dtype)             # (out, in)
        b = jnp.asarray(params[f'b{i}']).astype(jnp.float32)[:, None]  # (out, 1)
        flat.append(w)
        flat.append(b)
    return tuple(flat)


def fcnet_forward(x, flat_params, dim_output, *, tn=4096, num_core_split=1,
                  vmem_budget_bytes=24 * 1024 * 1024):
    """Pallas forward.  `flat_params` comes from prepare_params().

    Returns f32 logits of shape (batch, dim_output).

    tn              requested batch-tile width (lanes); auto-capped by the
                    VMEM budget and re-balanced across tiles.
    num_core_split  set to 2 on TPU v7x to shard the batch grid over both
                    TensorCores (pltpu.CORE_PARALLEL); leave at 1 on v5e/v6e.
    """
    batch, dim_input = x.shape
    num_layers = len(flat_params) // 2
    mxu_dtype = flat_params[0].dtype
    assert flat_params[-2].shape[0] == dim_output

    # ---- Tile sizing: as few grid steps as the VMEM budget allows (per-step
    # overhead ~0.35 us dwarfs the math for a net this small), balanced tiles,
    # and an even number of tiles when splitting across TensorCores.
    itemsize = jnp.dtype(mxu_dtype).itemsize
    widths = [w.shape[0] for w in flat_params[0::2]]
    max_width = max([dim_input] + widths)
    weight_bytes = sum(a.size * a.dtype.itemsize for a in flat_params)
    per_lane_bytes = (2 * dim_input * itemsize        # double-buffered x^T tile
                      + 2 * dim_output * 4            # double-buffered out tile
                      + 3 * max_width * 4)            # f32 intermediate headroom
    tn_max = max(LANE,
                 ((vmem_budget_bytes - weight_bytes) // per_lane_bytes) // LANE * LANE)
    tn_req = max(LANE, (min(tn, tn_max) // LANE) * LANE)
    tn_cap = min(tn_req, _round_up(batch, LANE))
    n_tiles = _cdiv(batch, tn_cap)
    if num_core_split > 1:
        n_tiles = _round_up(n_tiles, num_core_split)
    tn_eff = _round_up(_cdiv(batch, n_tiles), LANE)
    padded_batch = n_tiles * tn_eff

    # ---- Lane-dense input stream: x^T as (dim_input, padded_batch).
    x_t = x.T.astype(mxu_dtype)
    if padded_batch != batch:
        x_t = jnp.pad(x_t, ((0, 0), (0, padded_batch - batch)))

    # Weights/biases: whole-array, VMEM-resident across all grid steps.
    resident = lambda a: pl.BlockSpec(a.shape, lambda i: (0, 0))
    in_specs = ([pl.BlockSpec((dim_input, tn_eff), lambda i: (0, i))]
                + [resident(a) for a in flat_params])

    dim_sem = (pltpu.CORE_PARALLEL,) if num_core_split > 1 else ("parallel",)

    out_t = pl.pallas_call(
        _make_kernel(num_layers),
        out_shape=jax.ShapeDtypeStruct((dim_output, padded_batch), jnp.float32),
        grid_spec=pltpu.PrefetchScalarGridSpec(
            num_scalar_prefetch=0,
            grid=(n_tiles,),
            in_specs=in_specs,
            out_specs=pl.BlockSpec((dim_output, tn_eff), lambda i: (0, i)),
        ),
        compiler_params=pltpu.CompilerParams(
            dimension_semantics=dim_sem,
            vmem_limit_bytes=32 * 1024 * 1024,   # tiles capped at 24 MiB budget;
        ),                                       # safe on v7x's 64 MiB VMEM too
    )(x_t, *flat_params)

    # Un-transpose + drop batch padding; padded logits never reach the caller.
    return out_t[:, :batch].T


def init_params(key, dim_input, num_hidden_units, dim_output):
    """Kaiming-normal (fan_out, relu) init, matching initialise_weights(); zero biases."""
    dims = [dim_input] + list(num_hidden_units) + [dim_output]
    params = {}
    for i in range(len(dims) - 1):
        fan_in, fan_out = dims[i], dims[i + 1]
        key, sub = jax.random.split(key)
        std = (2.0 / fan_out) ** 0.5
        params[f'w{i + 1}'] = std * jax.random.normal(sub, (fan_out, fan_in), jnp.float32)
        params[f'b{i + 1}'] = jnp.zeros((fan_out,), jnp.float32)
    return params


def fcnet_reference(x, params):
    """Pure-JAX f32 reference mirroring the PyTorch forward (p_dropout=0)."""
    out = x
    for i in range(1, 5):
        out = out @ params[f'w{i}'].T + params[f'b{i}']
        if i < 4:
            out = jnp.maximum(out, 0.0)
    return out


if __name__ == "__main__":
    # batch deliberately NOT a multiple of the tile: exercises padding and the
    # balanced-tile logic; dims match a typical PLATIPUS FCNet instantiation.
    batch = 1000
    dim_input = 4
    num_hidden_units = (32, 32, 32)
    dim_output = 4

    key = jax.random.PRNGKey(0)
    key, kx = jax.random.split(key)
    x = jax.random.normal(kx, (batch, dim_input), jnp.float32)
    params = init_params(key, dim_input, num_hidden_units, dim_output)
    ref = fcnet_reference(x, params)

    # f32 path with a small tile (multi-step grid): tight accuracy check.
    fwd_multi = jax.jit(functools.partial(fcnet_forward, dim_output=dim_output, tn=512))
    flat_f32 = prepare_params(params, mxu_dtype=jnp.float32)
    out_f32 = jax.block_until_ready(fwd_multi(x, flat_f32))
    assert out_f32.shape == (batch, dim_output)
    assert jnp.allclose(out_f32, ref, atol=1e-4, rtol=1e-4), "f32 mismatch vs reference"

    # Default path: bf16 operands, one big balanced tile: loose check.
    fwd_big = jax.jit(functools.partial(fcnet_forward, dim_output=dim_output))
    flat_bf16 = prepare_params(params)                  # default mxu_dtype=bf16
    out_bf16 = jax.block_until_ready(fwd_big(x, flat_bf16))
    assert out_bf16.shape == (batch, dim_output)
    assert jnp.allclose(out_bf16, ref, atol=5e-2, rtol=5e-2), "bf16 mismatch vs reference"

    print("KERNEL_OK")
</pallas_src>

<mosaic_0001>
module attributes {stable_mosaic.version = 11 : i64} {
  func.func @kernel(%arg0: i32, %arg1: memref<4x512xf32, #tpu.memory_space<vmem>>, %arg2: memref<32x4xf32, #tpu.memory_space<vmem>>, %arg3: memref<32x1xf32, #tpu.memory_space<vmem>>, %arg4: memref<32x32xf32, #tpu.memory_space<vmem>>, %arg5: memref<32x1xf32, #tpu.memory_space<vmem>>, %arg6: memref<32x32xf32, #tpu.memory_space<vmem>>, %arg7: memref<32x1xf32, #tpu.memory_space<vmem>>, %arg8: memref<4x32xf32, #tpu.memory_space<vmem>>, %arg9: memref<4x1xf32, #tpu.memory_space<vmem>>, %arg10: memref<4x512xf32, #tpu.memory_space<vmem>>) attributes {dimension_semantics = [#tpu.dimension_semantics<parallel>], iteration_bounds = array<i64: 2>, scalar_prefetch = 0 : i64, scratch_operands = 0 : i64, tpu.core_type = #tpu.core_type<tc>, window_params = [{transform_indices = @transform_0, window_bounds = array<i64: 4, 512>}, {pipeline_mode = #tpu.pipeline_mode<synchronous>, transform_indices = @transform_1, window_bounds = array<i64: 32, 4>}, {pipeline_mode = #tpu.pipeline_mode<synchronous>, transform_indices = @transform_2, window_bounds = array<i64: 32, 1>}, {pipeline_mode = #tpu.pipeline_mode<synchronous>, transform_indices = @transform_3, window_bounds = array<i64: 32, 32>}, {pipeline_mode = #tpu.pipeline_mode<synchronous>, transform_indices = @transform_4, window_bounds = array<i64: 32, 1>}, {pipeline_mode = #tpu.pipeline_mode<synchronous>, transform_indices = @transform_5, window_bounds = array<i64: 32, 32>}, {pipeline_mode = #tpu.pipeline_mode<synchronous>, transform_indices = @transform_6, window_bounds = array<i64: 32, 1>}, {pipeline_mode = #tpu.pipeline_mode<synchronous>, transform_indices = @transform_7, window_bounds = array<i64: 4, 32>}, {pipeline_mode = #tpu.pipeline_mode<synchronous>, transform_indices = @transform_8, window_bounds = array<i64: 4, 1>}, {transform_indices = @transform_9, window_bounds = array<i64: 4, 512>}]} {
    %c0 = arith.constant 0 : index
    %c0_0 = arith.constant 0 : index
    %0 = vector.load %arg1[%c0, %c0_0] : memref<4x512xf32, #tpu.memory_space<vmem>>, vector<4x512xf32>
    %c0_1 = arith.constant 0 : index
    %c0_2 = arith.constant 0 : index
    %1 = vector.load %arg2[%c0_1, %c0_2] : memref<32x4xf32, #tpu.memory_space<vmem>>, vector<32x4xf32>
    %cst = arith.constant dense<0.000000e+00> : vector<32x512xf32>
    %2 = tpu.matmul %1, %0, %cst {dimension_numbers = #tpu.dot_dimension_numbers<[1], [0], [0], [1], [0, 0, 1, 1], [], []>} : vector<32x4xf32>, vector<4x512xf32>, vector<32x512xf32> -> vector<32x512xf32>
    %c0_3 = arith.constant 0 : index
    %c0_4 = arith.constant 0 : index
    %3 = vector.load %arg3[%c0_3, %c0_4] : memref<32x1xf32, #tpu.memory_space<vmem>>, vector<32x1xf32>
    %4 = vector.broadcast %3 : vector<32x1xf32> to vector<32x512xf32>
    %5 = arith.addf %2, %4 : vector<32x512xf32>
    %cst_5 = arith.constant 0.000000e+00 : f32
    %6 = vector.broadcast %cst_5 : f32 to vector<32x512xf32>
    %7 = arith.maximumf %5, %6 : vector<32x512xf32>
    %c0_6 = arith.constant 0 : index
    %c0_7 = arith.constant 0 : index
    %8 = vector.load %arg4[%c0_6, %c0_7] : memref<32x32xf32, #tpu.memory_space<vmem>>, vector<32x32xf32>
    %cst_8 = arith.constant dense<0.000000e+00> : vector<32x512xf32>
    %9 = tpu.matmul %8, %7, %cst_8 {dimension_numbers = #tpu.dot_dimension_numbers<[1], [0], [0], [1], [0, 0, 1, 1], [], []>} : vector<32x32xf32>, vector<32x512xf32>, vector<32x512xf32> -> vector<32x512xf32>
    %c0_9 = arith.constant 0 : index
    %c0_10 = arith.constant 0 : index
    %10 = vector.load %arg5[%c0_9, %c0_10] : memref<32x1xf32, #tpu.memory_space<vmem>>, vector<32x1xf32>
    %11 = vector.broadcast %10 : vector<32x1xf32> to vector<32x512xf32>
    %12 = arith.addf %9, %11 : vector<32x512xf32>
    %cst_11 = arith.constant 0.000000e+00 : f32
    %13 = vector.broadcast %cst_11 : f32 to vector<32x512xf32>
    %14 = arith.maximumf %12, %13 : vector<32x512xf32>
    %c0_12 = arith.constant 0 : index
    %c0_13 = arith.constant 0 : index
    %15 = vector.load %arg6[%c0_12, %c0_13] : memref<32x32xf32, #tpu.memory_space<vmem>>, vector<32x32xf32>
    %cst_14 = arith.constant dense<0.000000e+00> : vector<32x512xf32>
    %16 = tpu.matmul %15, %14, %cst_14 {dimension_numbers = #tpu.dot_dimension_numbers<[1], [0], [0], [1], [0, 0, 1, 1], [], []>} : vector<32x32xf32>, vector<32x512xf32>, vector<32x512xf32> -> vector<32x512xf32>
    %c0_15 = arith.constant 0 : index
    %c0_16 = arith.constant 0 : index
    %17 = vector.load %arg7[%c0_15, %c0_16] : memref<32x1xf32, #tpu.memory_space<vmem>>, vector<32x1xf32>
    %18 = vector.broadcast %17 : vector<32x1xf32> to vector<32x512xf32>
    %19 = arith.addf %16, %18 : vector<32x512xf32>
    %cst_17 = arith.constant 0.000000e+00 : f32
    %20 = vector.broadcast %cst_17 : f32 to vector<32x512xf32>
    %21 = arith.maximumf %19, %20 : vector<32x512xf32>
    %c0_18 = arith.constant 0 : index
    %c0_19 = arith.constant 0 : index
    %22 = vector.load %arg8[%c0_18, %c0_19] : memref<4x32xf32, #tpu.memory_space<vmem>>, vector<4x32xf32>
    %cst_20 = arith.constant dense<0.000000e+00> : vector<4x512xf32>
    %23 = tpu.matmul %22, %21, %cst_20 {dimension_numbers = #tpu.dot_dimension_numbers<[1], [0], [0], [1], [0, 0, 1, 1], [], []>} : vector<4x32xf32>, vector<32x512xf32>, vector<4x512xf32> -> vector<4x512xf32>
    %c0_21 = arith.constant 0 : index
    %c0_22 = arith.constant 0 : index
    %24 = vector.load %arg9[%c0_21, %c0_22] : memref<4x1xf32, #tpu.memory_space<vmem>>, vector<4x1xf32>
    %25 = vector.broadcast %24 : vector<4x1xf32> to vector<4x512xf32>
    %26 = arith.addf %23, %25 : vector<4x512xf32>
    %c0_23 = arith.constant 0 : index
    %c0_24 = arith.constant 0 : index
    %27 = vector.load %arg10[%c0_23, %c0_24] : memref<4x512xf32, #tpu.memory_space<vmem>>, vector<4x512xf32>
    tpu.vector_store %arg10[%c0_23, %c0_24], %26 {strides = array<i32>} : memref<4x512xf32, #tpu.memory_space<vmem>>, vector<4x512xf32>,
    return
  }
  func.func @transform_0(%arg0: i32) -> (i32, i32) {
    %c0_i32 = arith.constant 0 : i32
    %c0_i32_0 = arith.constant 0 : i32
    return %c0_i32, %arg0 : i32, i32
  }
  func.func @transform_1(%arg0: i32) -> (i32, i32) {
    %c0_i32 = arith.constant 0 : i32
    %c0_i32_0 = arith.constant 0 : i32
    %c0_i32_1 = arith.constant 0 : i32
    return %c0_i32, %c0_i32_0 : i32, i32
  }
  func.func @transform_2(%arg0: i32) -> (i32, i32) {
    %c0_i32 = arith.constant 0 : i32
    %c0_i32_0 = arith.constant 0 : i32
    %c0_i32_1 = arith.constant 0 : i32
    return %c0_i32, %c0_i32_0 : i32, i32
  }
  func.func @transform_3(%arg0: i32) -> (i32, i32) {
    %c0_i32 = arith.constant 0 : i32
    %c0_i32_0 = arith.constant 0 : i32
    %c0_i32_1 = arith.constant 0 : i32
    return %c0_i32, %c0_i32_0 : i32, i32
  }
  func.func @transform_4(%arg0: i32) -> (i32, i32) {
    %c0_i32 = arith.constant 0 : i32
    %c0_i32_0 = arith.constant 0 : i32
    %c0_i32_1 = arith.constant 0 : i32
    return %c0_i32, %c0_i32_0 : i32, i32
  }
  func.func @transform_5(%arg0: i32) -> (i32, i32) {
    %c0_i32 = arith.constant 0 : i32
    %c0_i32_0 = arith.constant 0 : i32
    %c0_i32_1 = arith.constant 0 : i32
    return %c0_i32, %c0_i32_0 : i32, i32
  }
  func.func @transform_6(%arg0: i32) -> (i32, i32) {
    %c0_i32 = arith.constant 0 : i32
    %c0_i32_0 = arith.constant 0 : i32
    %c0_i32_1 = arith.constant 0 : i32
    return %c0_i32, %c0_i32_0 : i32, i32
  }
  func.func @transform_7(%arg0: i32) -> (i32, i32) {
    %c0_i32 = arith.constant 0 : i32
    %c0_i32_0 = arith.constant 0 : i32
    %c0_i32_1 = arith.constant 0 : i32
    return %c0_i32, %c0_i32_0 : i32, i32
  }
  func.func @transform_8(%arg0: i32) -> (i32, i32) {
    %c0_i32 = arith.constant 0 : i32
    %c0_i32_0 = arith.constant 0 : i32
    %c0_i32_1 = arith.constant 0 : i32
    return %c0_i32, %c0_i32_0 : i32, i32
  }
  func.func @transform_9(%arg0: i32) -> (i32, i32) {
    %c0_i32 = arith.constant 0 : i32
    %c0_i32_0 = arith.constant 0 : i32
    return %c0_i32, %arg0 : i32, i32
  }
}

</mosaic_0001>

<bundles_post_ra>
// kernel: fcnet_forward.1
= control target key start
LH: loop header
LB: loop body
LE: loop exit
PB: predicated region body
PF: predicated region fallthrough
CT: control target
= control target key end

     0   :  { %s1436_s30 = smov 0   ;;  %s1590_s0 = inlined_call_operand.vmem [shape: f32[4,1024], index: 0, kind: input, shape index: {}]   ;;  %s1591_s1 = inlined_call_operand.vmem [shape: f32[32,4], index: 1, kind: input, shape index: {}]   ;;  %s1592_s2 = inlined_call_operand.vmem [shape: f32[32,1], index: 2, kind: input, shape index: {}]   ;;  %s1593_s3 = inlined_call_operand.vmem [shape: f32[32,32], index: 3, kind: input, shape index: {}]   ;;  %s1594_s4 = inlined_call_operand.vmem [shape: f32[32,1], index: 4, kind: input, shape index: {}]   ;;  %s1595_s5 = inlined_call_operand.vmem [shape: f32[32,32], index: 5, kind: input, shape index: {}]   ;;  %s1596_s6 = inlined_call_operand.vmem [shape: f32[32,1], index: 6, kind: input, shape index: {}]   ;;  %s1597_s7 = inlined_call_operand.vmem [shape: f32[4,32], index: 7, kind: input, shape index: {}]   ;;  %s1598_s8 = inlined_call_operand.vmem [shape: f32[4,1], index: 8, kind: input, shape index: {}]   ;;  %s1599_s9 = inlined_call_operand.vmem [shape: f32[4,1024], index: 9, kind: output, shape index: {}]  }
   0x1 LB: > { %s1273_s10 = sadd.s32 4294967295, %s1382_s30   ;;  %p1277_p0 = scmp.ge.s32.totalorder %s1382_s30, 1  ;;  %s1382_s30 = sphi %s1436_s30, %s19_s30  }
   0x2   : > { %p288_p1 = scmp.lt.s32.totalorder %s1382_s30, 3 }
   0x4   : > { %p289_p2 = pnand %p1277_p0, %p288_p1 }
   0x5   : > { %s1278_s11 = sshll.u32 (!%p289_p2), %s1273_s10, 2  ;;  %v1384_v0 = vmov (!%p289_p2), 0.0   ;;  %v342_v1 = vld [vmem:[%s1592_s2] sm:$0xff] (!%p289_p2)  ;;  %v1385_v2 = vmov (!%p289_p2), 0   ;;  %v344_v3 = vld [vmem:[%s1592_s2 + $0x10] sm:$0xff] (!%p289_p2)  ;;  %v343_v4 = vld [vmem:[%s1592_s2 + $0x8] sm:$0xff] (!%p289_p2) }
   0x6   : > { %292 = sbr.rel (%p289_p2) target bundleno = 944 (0x3b0), region = 56  ;;  %p325_p3 = scmp.lt.s32.totalorder (!%p289_p2), %s1278_s11, 7  ;;  %456 = vmatprep.mubr.f32.mxu0 (!%p289_p2), %v1384_v0  ;;  %545 = vmatprep.mubr.f32.mxu1 (!%p289_p2), %v1384_v0  ;;  %v345_v5 = vld [vmem:[%s1592_s2 + $0x18] sm:$0xff] (!%p289_p2)  ;;  %vm383_vm0 = vcmask (!%p289_p2), 1043456   ;;  %v338_v10 = vld [vmem:[%s1591_s1] sm:$0xff] (!%p289_p2)  ;;  %vm370_vm1 = vcmask (!%p289_p2), 31744  }
   0x7   : > { %1372 = vset.pattern.permute.xlu0 (!%p289_p2), %v1385_v2  ;;  %1373 = vset.pattern.permute.xlu1 (!%p289_p2), %v1385_v2  ;;  %v590_v11 = vld [vmem:[%s1594_s4] sm:$0xff] (!%p289_p2)  ;;  %v591_v12 = vld [vmem:[%s1594_s4 + $0x8] sm:$0xff] (!%p289_p2)  ;;  %v592_v14 = vld [vmem:[%s1594_s4 + $0x10] sm:$0xff] (!%p289_p2)  ;;  %vm614_vm2 = vcmask (!%p289_p2), 261120  }
   0x8   : > { %348 = vperm.xlu0 (!%p289_p2), %1372, %v342_v1   ;;  %358 = vperm.xlu1 (!%p289_p2), %1373, %v344_v3   ;;  %v339_v13 = vld [vmem:[%s1591_s1 + $0x8] sm:$0xff] (!%p289_p2)  ;;  %v593_v15 = vld [vmem:[%s1594_s4 + $0x18] sm:$0xff] (!%p289_p2)  ;;  %v340_v16 = vld [vmem:[%s1591_s1 + $0x10] sm:$0xff] (!%p289_p2) }
   0x9   : > { %v825_v17 = vld [vmem:[%s1596_s6] sm:$0xff] (!%p289_p2)  ;;  %v826_v18 = vld [vmem:[%s1596_s6 + $0x8] sm:$0xff] (!%p289_p2)  ;;  %v341_v19 = vld [vmem:[%s1591_s1 + $0x18] sm:$0xff] (!%p289_p2) }
   0xa   : > { %v827_v20 = vld [vmem:[%s1596_s6 + $0x10] sm:$0xff] (!%p289_p2)  ;;  %v828_v21 = vld [vmem:[%s1596_s6 + $0x18] sm:$0xff] (!%p289_p2)  ;;  %v1056_v22 = vld [vmem:[%s1598_s8] sm:$0xf] (!%p289_p2) }
   0xc   : > { %353 = vperm.xlu0 (!%p289_p2), %1372, %v343_v4   ;;  %363 = vperm.xlu1 (!%p289_p2), %1373, %v345_v5  }
   0xd   : > { %s1601_s11 = smov (!%p325_p3, %s1278_s11), 7 }
   0xe   : > { %s1279_s20 = sshll.u32 %s1601_s11, 2 }
   0xf   : > { %s328_s23 = scalar_lea.vmem %s1590_s0, %s1279_s20  ;;  %s334_s15 = scalar_lea.vmem %s1599_s9, %s1279_s20 }
  0x10   : > { %v336_v6 = vld [vmem:[%s328_s23] sm:$0xff]  ;;  %v337_v7 = vld [vmem:[%s328_s23 + $0x8] sm:$0xff]  ;;  %596 = vperm.xlu0 %1372, %v590_v11   ;;  %601 = vperm.xlu1 %1373, %v591_v12  }
  0x11   : > { %v368_v8 = vcombine.high %v336_v6, %v336_v6  ;;  %v369_v9 = vcombine.high %v337_v7, %v337_v7 }
  0x13   : > { %1282 = vmatprep.subr.msk.mxu0 %vm383_vm0, %v368_v8  ;;  %1288 = vmatprep.subr.msk.mxu1 %vm383_vm0, %v369_v9 }
  0x14   : > { %1283 = vmatpush1.msk.msra.mxu0 %vm383_vm0, %v336_v6  ;;  %1289 = vmatpush1.msk.msra.mxu1 %vm383_vm0, %v337_v7 }
  0x15   : > { %1284 = vmatmul.mubr.msk.f32.vlgmr.msra.gmra.mrb[0].mxu0 %vm370_vm1, %v338_v10  ;;  %1290 = vmatmul.mubr.msk.f32.vlgmr.msra.gmra.mrb[0].mxu1 %vm370_vm1, %v338_v10 }
  0x16   : > { %462 = vmatprep.mubr.f32.mxu0 %v1384_v0  ;;  %551 = vmatprep.mubr.f32.mxu1 %v1384_v0 }
  0x17   : > { %606 = vperm.xlu0 %1372, %v592_v14   ;;  %611 = vperm.xlu1 %1373, %v593_v15  }
  0x19   : > { %1285 = vmatmul.mubr.msk.f32.gmra.mrb[2].mxu0 %vm370_vm1, %v339_v13  ;;  %1291 = vmatmul.mubr.msk.f32.gmra.mrb[2].mxu1 %vm370_vm1, %v339_v13 }
  0x1a   : > { %468 = vmatprep.mubr.f32.mxu0 %v1384_v0  ;;  %557 = vmatprep.mubr.f32.mxu1 %v1384_v0 }
  0x1b   : > { %831 = vperm.xlu0 %1372, %v825_v17   ;;  %836 = vperm.xlu1 %1373, %v826_v18  }
  0x1d   : > { %1286 = vmatmul.mubr.msk.f32.gmra.mrb[4].mxu0 %vm370_vm1, %v340_v16  ;;  %1292 = vmatmul.mubr.msk.f32.gmra.mrb[4].mxu1 %vm370_vm1, %v340_v16 }
  0x1e   : > { %474 = vmatprep.mubr.f32.mxu0 %v1384_v0  ;;  %563 = vmatprep.mubr.f32.mxu1 %v1384_v0 }
  0x1f   : > { %841 = vperm.xlu0 %1372, %v827_v20   ;;  %846 = vperm.xlu1 %1373, %v828_v21   ;;  %v586_v20 = vld [vmem:[%s1593_s3] sm:$0xff]  ;;  %v587_v21 = vld [vmem:[%s1593_s3 + $0x8] sm:$0xff] }
  0x21   : > { %1287 = vmatmul.mubr.msk.f32.gmra.mrb[6].mxu0 %vm370_vm1, %v341_v19  ;;  %1293 = vmatmul.mubr.msk.f32.gmra.mrb[6].mxu1 %vm370_vm1, %v341_v19 }
  0x22   : > { %691 = vmatprep.mubr.f32.mxu0 %v1384_v0  ;;  %780 = vmatprep.mubr.f32.mxu1 %v1384_v0 }
  0x23   : > { %1059 = vperm.xlu0 %1372, %v1056_v22   ;;  %v588_v22 = vld [vmem:[%s1593_s3 + $0x10] sm:$0xff] }
  0x87   : > { %v349_v23 = vpop.permute.xlu0 %348  ;;  %v359_v29 = vpop.permute.xlu1 %358 }
  0x8b   : > { %v354_v28 = vpop.permute.xlu0 %353  ;;  %v364_v58 = vpop.permute.xlu1 %363 }
  0xe8   : > { %v458_v24 = vpop.f32.mrb[0].mxu0  ;;  %v547_v25 = vpop.f32.mrb[0].mxu1 }
  0xe9   : > { %v460_v26 = vpop.f32.mrb[1].mxu0  ;;  %v549_v27 = vpop.f32.mrb[1].mxu1  ;;  %v459_v30 = vadd.f32 %v458_v24, %v349_v23  ;;  %v548_v31 = vadd.f32 %v547_v25, %v349_v23 }
  0xea   : > { %v461_v32 = vadd.f32 %v460_v26, %v349_v23  ;;  %v550_v33 = vadd.f32 %v549_v27, %v349_v23  ;;  %v589_v23 = vld [vmem:[%s1593_s3 + $0x18] sm:$0xff] }
  0xeb   : > { %v570_v42 = vmax.f32 %v459_v30, 0.0  ;;  %v572_v43 = vmax.f32 %v548_v31, 0.0 }
  0xec   : > { %v464_v34 = vpop.f32.mrb[2].mxu0  ;;  %v553_v35 = vpop.f32.mrb[2].mxu1  ;;  %v571_v46 = vmax.f32 %v461_v32, 0.0  ;;  %v573_v47 = vmax.f32 %v550_v33, 0.0 }
  0xed   : > { %v465_v36 = vadd.f32 %v464_v34, %v354_v28  ;;  %v554_v37 = vadd.f32 %v553_v35, %v354_v28  ;;  %v466_v38 = vpop.f32.mrb[3].mxu0  ;;  %v555_v39 = vpop.f32.mrb[3].mxu1 }
  0xee   : > { %v467_v40 = vadd.f32 %v466_v38, %v354_v28  ;;  %v556_v41 = vadd.f32 %v555_v39, %v354_v28  ;;  %v597_v28 = vpop.permute.xlu0 %596 }
  0xef   : > { %v574_v44 = vmax.f32 %v465_v36, 0.0  ;;  %v576_v45 = vmax.f32 %v554_v37, 0.0 }
  0xf0   : > { %v575_v48 = vmax.f32 %v467_v40, 0.0  ;;  %v577_v49 = vmax.f32 %v556_v41, 0.0  ;;  %v470_v50 = vpop.f32.mrb[4].mxu0  ;;  %v559_v51 = vpop.f32.mrb[4].mxu1 }
  0xf1   : > { %v1316_v52 = vpack.c.bf16 %v574_v44, %v570_v42  ;;  %v1324_v53 = vpack.c.bf16 %v576_v45, %v572_v43  ;;  %v472_v54 = vpop.f32.mrb[5].mxu0  ;;  %v561_v55 = vpop.f32.mrb[5].mxu1  ;;  %v471_v59 = vadd.f32 %v470_v50, %v359_v29  ;;  %v560_v60 = vadd.f32 %v559_v51, %v359_v29 }
  0xf2   : > { %v1314_v56 = vpack.c.bf16 %v575_v48, %v571_v46  ;;  %v1322_v57 = vpack.c.bf16 %v577_v49, %v573_v47  ;;  %v473_v61 = vadd.f32 %v472_v54, %v359_v29  ;;  %v562_v62 = vadd.f32 %v561_v55, %v359_v29  ;;  %v602_v29 = vpop.permute.xlu1 %601 }
  0xf3   : > { %v578_v8 = vmax.f32 %v471_v59, 0.0  ;;  %v580_v9 = vmax.f32 %v560_v60, 0.0 }
  0xf4   : > { %v476_v63 = vpop.f32.mrb[6].mxu0  ;;  %v565_v1 = vpop.f32.mrb[6].mxu1  ;;  %1315 = vmatprep.subr.bf16.mxu0 %v1314_v56  ;;  %1323 = vmatprep.subr.bf16.mxu1 %v1322_v57  ;;  %v579_v12 = vmax.f32 %v473_v61, 0.0  ;;  %v581_v13 = vmax.f32 %v562_v62, 0.0 }
  0xf5   : > { %v477_v2 = vadd.f32 %v476_v63, %v364_v58  ;;  %v566_v3 = vadd.f32 %v565_v1, %v364_v58  ;;  %v478_v4 = vpop.f32.mrb[7].mxu0  ;;  %v567_v5 = vpop.f32.mrb[7].mxu1  ;;  %1317 = vmatpush1.bf16.msra.mxu0 %v1316_v52  ;;  %1325 = vmatpush1.bf16.msra.mxu1 %v1324_v53 }
  0xf6   : > { %v479_v6 = vadd.f32 %v478_v4, %v364_v58  ;;  %v568_v7 = vadd.f32 %v567_v5, %v364_v58  ;;  %v607_v56 = vpop.permute.xlu0 %606  ;;  %v612_v59 = vpop.permute.xlu1 %611 }
  0xf7   : > { %v582_v10 = vmax.f32 %v477_v2, 0.0  ;;  %v584_v11 = vmax.f32 %v566_v3, 0.0 }
  0xf8   : > { %v583_v14 = vmax.f32 %v479_v6, 0.0  ;;  %v585_v15 = vmax.f32 %v568_v7, 0.0 }
  0xf9   : > { %v1320_v16 = vpack.c.bf16 %v582_v10, %v578_v8  ;;  %v1328_v17 = vpack.c.bf16 %v584_v11, %v580_v9 }
  0xfa   : > { %v1318_v18 = vpack.c.bf16 %v583_v14, %v579_v12  ;;  %v1326_v19 = vpack.c.bf16 %v585_v15, %v581_v13 }
  0xfc   : > { %1319 = vmatprep.subr.bf16.mxu0 %v1318_v18  ;;  %1327 = vmatprep.subr.bf16.mxu1 %v1326_v19 }
  0xfd   : > { %1321 = vmatpush1.bf16.msra.mxu0 %v1320_v16  ;;  %1329 = vmatpush1.bf16.msra.mxu1 %v1328_v17 }
 0x100   : > { %1294 = vmatmul.mubr.msk.f32.vlgmr.msra.gmra.mrb[8].mxu0 %vm614_vm2, %v586_v20  ;;  %1298 = vmatmul.mubr.msk.f32.vlgmr.msra.gmra.mrb[8].mxu1 %vm614_vm2, %v586_v20 }
 0x101   : > { %697 = vmatprep.mubr.f32.mxu0 %v1384_v0  ;;  %786 = vmatprep.mubr.f32.mxu1 %v1384_v0 }
 0x104   : > { %1295 = vmatmul.mubr.msk.f32.gmra.mrb[10].mxu0 %vm614_vm2, %v587_v21  ;;  %1299 = vmatmul.mubr.msk.f32.gmra.mrb[10].mxu1 %vm614_vm2, %v587_v21  ;;  %v821_v21 = vld [vmem:[%s1595_s5] sm:$0xff] }
 0x105   : > { %703 = vmatprep.mubr.f32.mxu0 %v1384_v0  ;;  %792 = vmatprep.mubr.f32.mxu1 %v1384_v0 }
 0x108   : > { %1296 = vmatmul.mubr.msk.f32.gmra.mrb[12].mxu0 %vm614_vm2, %v588_v22  ;;  %1300 = vmatmul.mubr.msk.f32.gmra.mrb[12].mxu1 %vm614_vm2, %v588_v22  ;;  %v822_v22 = vld [vmem:[%s1595_s5 + $0x8] sm:$0xff] }
 0x109   : > { %709 = vmatprep.mubr.f32.mxu0 %v1384_v0  ;;  %798 = vmatprep.mubr.f32.mxu1 %v1384_v0 }
 0x10c   : > { %1297 = vmatmul.mubr.msk.f32.gmra.mrb[14].mxu0 %vm614_vm2, %v589_v23  ;;  %1301 = vmatmul.mubr.msk.f32.gmra.mrb[14].mxu1 %vm614_vm2, %v589_v23  ;;  %v823_v23 = vld [vmem:[%s1595_s5 + $0x10] sm:$0xff] }
 0x10d   : > { %925 = vmatprep.mubr.f32.mxu0 %v1384_v0  ;;  %1014 = vmatprep.mubr.f32.mxu1 %v1384_v0 }
 0x1d3   : > { %v693_v24 = vpop.f32.mrb[8].mxu0  ;;  %v782_v25 = vpop.f32.mrb[8].mxu1 }
 0x1d4   : > { %v695_v26 = vpop.f32.mrb[9].mxu0  ;;  %v784_v27 = vpop.f32.mrb[9].mxu1  ;;  %v694_v30 = vadd.f32 %v693_v24, %v597_v28  ;;  %v783_v31 = vadd.f32 %v782_v25, %v597_v28  ;;  %v824_v24 = vld [vmem:[%s1595_s5 + $0x18] sm:$0xff] }
 0x1d5   : > { %v696_v32 = vadd.f32 %v695_v26, %v597_v28  ;;  %v785_v33 = vadd.f32 %v784_v27, %v597_v28 }
 0x1d6   : > { %v805_v42 = vmax.f32 %v694_v30, 0.0  ;;  %v807_v43 = vmax.f32 %v783_v31, 0.0  ;;  %v837_v30 = vpop.permute.xlu1 %836 }
 0x1d7   : > { %v699_v34 = vpop.f32.mrb[10].mxu0  ;;  %v788_v35 = vpop.f32.mrb[10].mxu1  ;;  %v806_v46 = vmax.f32 %v696_v32, 0.0  ;;  %v808_v47 = vmax.f32 %v785_v33, 0.0 }
 0x1d8   : > { %v700_v36 = vadd.f32 %v699_v34, %v602_v29  ;;  %v789_v37 = vadd.f32 %v788_v35, %v602_v29  ;;  %v701_v38 = vpop.f32.mrb[11].mxu0  ;;  %v790_v39 = vpop.f32.mrb[11].mxu1 }
 0x1d9   : > { %v702_v40 = vadd.f32 %v701_v38, %v602_v29  ;;  %v791_v41 = vadd.f32 %v790_v39, %v602_v29  ;;  %v832_v29 = vpop.permute.xlu0 %831 }
 0x1da   : > { %v809_v44 = vmax.f32 %v700_v36, 0.0  ;;  %v811_v45 = vmax.f32 %v789_v37, 0.0 }
 0x1db   : > { %v810_v48 = vmax.f32 %v702_v40, 0.0  ;;  %v812_v49 = vmax.f32 %v791_v41, 0.0  ;;  %v705_v50 = vpop.f32.mrb[12].mxu0  ;;  %v794_v51 = vpop.f32.mrb[12].mxu1 }
 0x1dc   : > { %v1332_v52 = vpack.c.bf16 %v809_v44, %v805_v42  ;;  %v1340_v53 = vpack.c.bf16 %v811_v45, %v807_v43  ;;  %v707_v54 = vpop.f32.mrb[13].mxu0  ;;  %v796_v55 = vpop.f32.mrb[13].mxu1  ;;  %v706_v60 = vadd.f32 %v705_v50, %v607_v56  ;;  %v795_v61 = vadd.f32 %v794_v51, %v607_v56 }
 0x1dd   : > { %v1330_v57 = vpack.c.bf16 %v810_v48, %v806_v46  ;;  %v1338_v58 = vpack.c.bf16 %v812_v49, %v808_v47  ;;  %v708_v62 = vadd.f32 %v707_v54, %v607_v56  ;;  %v797_v63 = vadd.f32 %v796_v55, %v607_v56  ;;  %v842_v56 = vpop.permute.xlu0 %841 }
 0x1de   : > { %v813_v9 = vmax.f32 %v706_v60, 0.0  ;;  %v815_v10 = vmax.f32 %v795_v61, 0.0 }
 0x1df   : > { %v711_v1 = vpop.f32.mrb[14].mxu0  ;;  %v800_v2 = vpop.f32.mrb[14].mxu1  ;;  %1331 = vmatprep.subr.bf16.mxu0 %v1330_v57  ;;  %1339 = vmatprep.subr.bf16.mxu1 %v1338_v58  ;;  %v814_v13 = vmax.f32 %v708_v62, 0.0  ;;  %v816_v14 = vmax.f32 %v797_v63, 0.0 }
 0x1e0   : > { %v712_v3 = vadd.f32 %v711_v1, %v612_v59  ;;  %v801_v4 = vadd.f32 %v800_v2, %v612_v59  ;;  %v713_v5 = vpop.f32.mrb[15].mxu0  ;;  %v802_v6 = vpop.f32.mrb[15].mxu1  ;;  %1333 = vmatpush1.bf16.msra.mxu0 %v1332_v52  ;;  %1341 = vmatpush1.bf16.msra.mxu1 %v1340_v53 }
 0x1e1   : > { %v714_v7 = vadd.f32 %v713_v5, %v612_v59  ;;  %v803_v8 = vadd.f32 %v802_v6, %v612_v59  ;;  %v847_v59 = vpop.permute.xlu1 %846 }
 0x1e2   : > { %v817_v11 = vmax.f32 %v712_v3, 0.0  ;;  %v819_v12 = vmax.f32 %v801_v4, 0.0 }
 0x1e3   : > { %v818_v15 = vmax.f32 %v714_v7, 0.0  ;;  %v820_v16 = vmax.f32 %v803_v8, 0.0 }
 0x1e4   : > { %v1336_v17 = vpack.c.bf16 %v817_v11, %v813_v9  ;;  %v1344_v18 = vpack.c.bf16 %v819_v12, %v815_v10 }
 0x1e5   : > { %v1334_v19 = vpack.c.bf16 %v818_v15, %v814_v13  ;;  %v1342_v20 = vpack.c.bf16 %v820_v16, %v816_v14 }
 0x1e7   : > { %1335 = vmatprep.subr.bf16.mxu0 %v1334_v19  ;;  %1343 = vmatprep.subr.bf16.mxu1 %v1342_v20 }
 0x1e8   : > { %1337 = vmatpush1.bf16.msra.mxu0 %v1336_v17  ;;  %1345 = vmatpush1.bf16.msra.mxu1 %v1344_v18 }
 0x1eb   : > { %1302 = vmatmul.mubr.msk.f32.vlgmr.msra.gmra.mrb[16].mxu0 %vm614_vm2, %v821_v21  ;;  %1306 = vmatmul.mubr.msk.f32.vlgmr.msra.gmra.mrb[16].mxu1 %vm614_vm2, %v821_v21  ;;  %v1055_v21 = vld [vmem:[%s1597_s7] sm:$0xf] }
 0x1ec   : > { %931 = vmatprep.mubr.f32.mxu0 %v1384_v0  ;;  %1020 = vmatprep.mubr.f32.mxu1 %v1384_v0 }
 0x1ef   : > { %1303 = vmatmul.mubr.msk.f32.gmra.mrb[18].mxu0 %vm614_vm2, %v822_v22  ;;  %1307 = vmatmul.mubr.msk.f32.gmra.mrb[18].mxu1 %vm614_vm2, %v822_v22  ;;  %v1060_v22 = vpop.permute.xlu0 %1059 }
 0x1f0   : > { %937 = vmatprep.mubr.f32.mxu0 %v1384_v0  ;;  %1026 = vmatprep.mubr.f32.mxu1 %v1384_v0 }
 0x1f3   : > { %1304 = vmatmul.mubr.msk.f32.gmra.mrb[20].mxu0 %vm614_vm2, %v823_v23  ;;  %1308 = vmatmul.mubr.msk.f32.gmra.mrb[20].mxu1 %vm614_vm2, %v823_v23 }
 0x1f4   : > { %943 = vmatprep.mubr.f32.mxu0 %v1384_v0  ;;  %1032 = vmatprep.mubr.f32.mxu1 %v1384_v0 }
 0x1f7   : > { %1305 = vmatmul.mubr.msk.f32.gmra.mrb[22].mxu0 %vm614_vm2, %v824_v24  ;;  %1309 = vmatmul.mubr.msk.f32.gmra.mrb[22].mxu1 %vm614_vm2, %v824_v24 }
 0x1f8   : > { %1129 = vmatprep.mubr.f32.mxu0 %v1384_v0  ;;  %1200 = vmatprep.mubr.f32.mxu1 %v1384_v0 }
 0x2be   : > { %v927_v25 = vpop.f32.mrb[16].mxu0  ;;  %v1016_v26 = vpop.f32.mrb[16].mxu1 }
 0x2bf   : > { %v929_v27 = vpop.f32.mrb[17].mxu0  ;;  %v1018_v28 = vpop.f32.mrb[17].mxu1  ;;  %v928_v31 = vadd.f32 %v927_v25, %v832_v29  ;;  %v1017_v32 = vadd.f32 %v1016_v26, %v832_v29 }
 0x2c0   : > { %v930_v33 = vadd.f32 %v929_v27, %v832_v29  ;;  %v1019_v34 = vadd.f32 %v1018_v28, %v832_v29 }
 0x2c1   : > { %v1039_v43 = vmax.f32 %v928_v31, 0.0  ;;  %v1041_v0 = vmax.f32 %v1017_v32, 0.0 }
 0x2c2   : > { %v933_v35 = vpop.f32.mrb[18].mxu0  ;;  %v1022_v36 = vpop.f32.mrb[18].mxu1  ;;  %v1040_v46 = vmax.f32 %v930_v33, 0.0  ;;  %v1042_v47 = vmax.f32 %v1019_v34, 0.0 }
 0x2c3   : > { %v934_v37 = vadd.f32 %v933_v35, %v837_v30  ;;  %v1023_v38 = vadd.f32 %v1022_v36, %v837_v30  ;;  %v935_v39 = vpop.f32.mrb[19].mxu0  ;;  %v1024_v40 = vpop.f32.mrb[19].mxu1 }
 0x2c4   : > { %v936_v41 = vadd.f32 %v935_v39, %v837_v30  ;;  %v1025_v42 = vadd.f32 %v1024_v40, %v837_v30 }
 0x2c5   : > { %v1043_v44 = vmax.f32 %v934_v37, 0.0  ;;  %v1045_v45 = vmax.f32 %v1023_v38, 0.0 }
 0x2c6   : > { %v1044_v48 = vmax.f32 %v936_v41, 0.0  ;;  %v1046_v49 = vmax.f32 %v1025_v42, 0.0  ;;  %v939_v50 = vpop.f32.mrb[20].mxu0  ;;  %v1028_v51 = vpop.f32.mrb[20].mxu1 }
 0x2c7   : > { %v1348_v52 = vpack.c.bf16 %v1043_v44, %v1039_v43  ;;  %v1356_v53 = vpack.c.bf16 %v1045_v45, %v1041_v0  ;;  %v941_v54 = vpop.f32.mrb[21].mxu0  ;;  %v1030_v55 = vpop.f32.mrb[21].mxu1  ;;  %v940_v60 = vadd.f32 %v939_v50, %v842_v56  ;;  %v1029_v61 = vadd.f32 %v1028_v51, %v842_v56 }
 0x2c8   : > { %v1346_v57 = vpack.c.bf16 %v1044_v48, %v1040_v46  ;;  %v1354_v58 = vpack.c.bf16 %v1046_v49, %v1042_v47  ;;  %v942_v62 = vadd.f32 %v941_v54, %v842_v56  ;;  %v1031_v63 = vadd.f32 %v1030_v55, %v842_v56 }
 0x2c9   : > { %v1047_v9 = vmax.f32 %v940_v60, 0.0  ;;  %v1049_v10 = vmax.f32 %v1029_v61, 0.0 }
 0x2ca   : > { %v945_v1 = vpop.f32.mrb[22].mxu0  ;;  %v1034_v2 = vpop.f32.mrb[22].mxu1  ;;  %1347 = vmatprep.subr.bf16.mxu0 %v1346_v57  ;;  %1355 = vmatprep.subr.bf16.mxu1 %v1354_v58  ;;  %v1048_v13 = vmax.f32 %v942_v62, 0.0  ;;  %v1050_v14 = vmax.f32 %v1031_v63, 0.0 }
 0x2cb   : > { %v946_v3 = vadd.f32 %v945_v1, %v847_v59  ;;  %v1035_v4 = vadd.f32 %v1034_v2, %v847_v59  ;;  %v947_v5 = vpop.f32.mrb[23].mxu0  ;;  %v1036_v6 = vpop.f32.mrb[23].mxu1  ;;  %1349 = vmatpush1.bf16.msra.mxu0 %v1348_v52  ;;  %1357 = vmatpush1.bf16.msra.mxu1 %v1356_v53 }
 0x2cc   : > { %v948_v7 = vadd.f32 %v947_v5, %v847_v59  ;;  %v1037_v8 = vadd.f32 %v1036_v6, %v847_v59 }
 0x2cd   : > { %v1051_v11 = vmax.f32 %v946_v3, 0.0  ;;  %v1053_v12 = vmax.f32 %v1035_v4, 0.0 }
 0x2ce   : > { %v1052_v15 = vmax.f32 %v948_v7, 0.0  ;;  %v1054_v16 = vmax.f32 %v1037_v8, 0.0 }
 0x2cf   : > { %v1352_v17 = vpack.c.bf16 %v1051_v11, %v1047_v9  ;;  %v1360_v18 = vpack.c.bf16 %v1053_v12, %v1049_v10 }
 0x2d0   : > { %v1350_v19 = vpack.c.bf16 %v1052_v15, %v1048_v13  ;;  %v1358_v20 = vpack.c.bf16 %v1054_v16, %v1050_v14 }
 0x2d2   : > { %1351 = vmatprep.subr.bf16.mxu0 %v1350_v19  ;;  %1359 = vmatprep.subr.bf16.mxu1 %v1358_v20 }
 0x2d3   : > { %1353 = vmatpush1.bf16.msra.mxu0 %v1352_v17  ;;  %1361 = vmatpush1.bf16.msra.mxu1 %v1360_v18 }
 0x2d6   : > { %1310 = vmatmul.mubr.msk.f32.vlgmr.msra.gmra.mrb[24].mxu0 %vm614_vm2, %v1055_v21  ;;  %1311 = vmatmul.mubr.msk.f32.vlgmr.msra.gmra.mrb[24].mxu1 %vm614_vm2, %v1055_v21 }
 0x3a9   : > { %v1131_v23 = vpop.f32.mrb[24].mxu0  ;;  %v1202_v24 = vpop.f32.mrb[24].mxu1 }
 0x3aa   : > { %v1132_v25 = vadd.f32 %v1131_v23, %v1060_v22  ;;  %v1203_v26 = vadd.f32 %v1202_v24, %v1060_v22  ;;  %v1133_v27 = vpop.f32.mrb[25].mxu0  ;;  %v1204_v28 = vpop.f32.mrb[25].mxu1 }
 0x3ab   : > { %v1134_v29 = vadd.f32 %v1133_v27, %v1060_v22  ;;  %v1205_v30 = vadd.f32 %v1204_v28, %v1060_v22 }
 0x3ad   : > { %v1211_v31 = vcombine.low %v1132_v25, %v1134_v29  ;;  %v1212_v32 = vcombine.low %v1203_v26, %v1205_v30 }
 0x3af   : > { %1215 = vst [vmem:[%s334_s15] sm:$0xff] %v1211_v31  ;;  %1216 = vst [vmem:[%s334_s15 + $0x8] sm:$0xff] %v1212_v32 }
 0x3b0 PF: > { %s19_s30 = sadd.s32 1, %s1382_s30  }
 0x3b1   : > { %p16_p4 = scmp.ge.s32.totalorder %s19_s30, 4  }
 0x3b3   :  { %18 = sbr.rel (!%p16_p4) target bundleno = 1 (0x1), region = 86 }

</bundles_post_ra>
